<compile_context>
chip_gen: v6e
topology: v6e:2x2x1
jax: 0.10.0
libtpu: 0.0.40
codegen_flags: <defaults>
</compile_context>

<pallas_src>
import functools

import jax
import jax.numpy as jnp
from jax.experimental import pallas as pl
from jax.experimental.pallas import tpu as pltpu


def _linear_kernel(x_ref, w_ref, b_ref, o_ref):
    # One tile of edges: (tm, in_dim) bf16 @ (in_dim, emb_dim) bf16 -> f32 MXU
    # (single pass), then f32 bias add, f32 store.
    acc = jnp.dot(x_ref[...], w_ref[...], preferred_element_type=jnp.float32)
    o_ref[...] = (acc + b_ref[...]).astype(o_ref.dtype)


def _cdiv(a, b):
    return -(-a // b)


def _round_up(x, m):
    return ((x + m - 1) // m) * m


def _lane(n):  # lane-axis padding (last dim -> multiple of 128)
    return _round_up(n, 128)


@functools.partial(jax.jit, static_argnames=("tile_m",))
def linear_edge_encoder(edge_attr, w_t, bias, *, tile_m=4096):
    """edge_attr: (E, in_dim), w_t: (in_dim, emb_dim), bias: (emb_dim,)."""
    E, in_dim = edge_attr.shape
    emb_dim = w_t.shape[1]
    out_dtype = bias.dtype  # f32, matching torch.nn.Linear with f32 params

    if E == 0:  # degenerate batch guard (trace-time, shapes are static)
        return jnp.zeros((0, emb_dim), out_dtype)

    # bf16 operands (cast is a no-op if the caller already supplies bf16).
    x = edge_attr if edge_attr.dtype == jnp.bfloat16 else edge_attr.astype(jnp.bfloat16)
    w = w_t if w_t.dtype == jnp.bfloat16 else w_t.astype(jnp.bfloat16)
    bias2d = bias.reshape(1, emb_dim).astype(jnp.float32)

    # --- Tile selection (trace-time Python on static shapes) -----------------
    tm = _round_up(_cdiv(E, 8), 8)              # aim for ~8 grid steps (>=4/core on v7x)
    tm = max(tm, min(1024, _round_up(E, 8)))    # stay above the ~1 MiB per-step knee
    tm = min(tm, tile_m)                        # VMEM cap (see accounting below)
    tm = min(tm, _round_up(E, 8))               # never exceed the padded edge count
    tm = max(tm, 8)
    grid_m = _cdiv(E, tm)
    # Prefer an even grid so both v7x TensorCores get equal step counts (and
    # one core doesn't take both the extra step and the ragged tail block).
    if grid_m > 2 and grid_m % 2 == 1:
        tm_alt = max(8, _round_up(_cdiv(E, grid_m + 1), 8))
        if _cdiv(E, tm_alt) % 2 == 0:
            tm, grid_m = tm_alt, _cdiv(E, tm_alt)

    # --- VMEM accounting (lane-padded, double-buffered) -----------------------
    bytes_x_blk = tm * _lane(in_dim) * 2                 # bf16 x tile
    bytes_o_blk = tm * _lane(emb_dim) * 4                # f32 out tile
    bytes_w = _round_up(in_dim, 16) * _lane(emb_dim) * 2  # bf16 weight
    bytes_b = 8 * _lane(emb_dim) * 4                      # f32 bias (sublane-padded)
    vmem_bytes = 2 * (bytes_x_blk + bytes_o_blk + bytes_w + bytes_b)
    vmem_limit = None
    if vmem_bytes > (14 << 20):  # would exceed v5e's 16 MiB default scoped limit
        vmem_limit = min(vmem_bytes + (4 << 20), 48 << 20)

    cost = pl.CostEstimate(
        flops=2 * E * in_dim * emb_dim,
        transcendentals=0,
        bytes_accessed=E * in_dim * 2            # bf16 x read
        + E * emb_dim * 4                        # f32 out write
        + in_dim * emb_dim * 2 + emb_dim * 4,    # params
    )

    return pl.pallas_call(
        _linear_kernel,
        out_shape=jax.ShapeDtypeStruct((E, emb_dim), out_dtype),
        grid_spec=pltpu.PrefetchScalarGridSpec(
            num_scalar_prefetch=0,
            grid=(grid_m,),
            in_specs=[
                pl.BlockSpec((tm, in_dim), lambda i: (i, 0)),
                pl.BlockSpec((in_dim, emb_dim), lambda i: (0, 0)),
                pl.BlockSpec((1, emb_dim), lambda i: (0, 0)),
            ],
            out_specs=pl.BlockSpec((tm, emb_dim), lambda i: (i, 0)),
        ),
        compiler_params=pltpu.CompilerParams(
            dimension_semantics=("parallel",),
            vmem_limit_bytes=vmem_limit,
        ),
        cost_estimate=cost,
    )(x, w, bias2d)


if __name__ == "__main__":
    # BPIC12W configuration: in_dim = 68; small emb_dim.
    in_dim = 68
    emb_dim = 32
    num_edges = 200  # number of edges in the batch (not tile-aligned on purpose)

    key = jax.random.PRNGKey(0)
    k_x, k_w, k_b = jax.random.split(key, 3)

    # Deterministic parameter init mimicking torch.nn.Linear (uniform +-1/sqrt(in_dim)).
    bound = 1.0 / (in_dim ** 0.5)
    weight = jax.random.uniform(k_w, (emb_dim, in_dim), jnp.float32, -bound, bound)
    bias = jax.random.uniform(k_b, (emb_dim,), jnp.float32, -bound, bound)

    # Parameter prep ONCE (not per call): transpose to (in_dim, emb_dim) and
    # pre-cast to bf16 so the kernel's weight read is already half-width.
    w_t = jnp.asarray(weight.T, dtype=jnp.bfloat16)

    # edge_attr input (already flat (E, in_dim), matching .view(-1, in_dim)).
    edge_attr = jax.random.normal(k_x, (num_edges, in_dim), jnp.float32)

    out = linear_edge_encoder(edge_attr, w_t, bias)
    out = jax.block_until_ready(out)

    # Reference #1: same bf16-quantized operands, f32 accumulation (what the
    # MXU computes) -> tight tolerance.
    xq = edge_attr.astype(jnp.bfloat16).astype(jnp.float32)
    wq = w_t.astype(jnp.float32)
    ref = xq @ wq + bias
    assert out.shape == (num_edges, emb_dim), out.shape
    assert out.dtype == jnp.float32, out.dtype
    assert jnp.allclose(out, ref, atol=1e-3, rtol=1e-3), "mismatch vs bf16 reference"

    # Reference #2: full-precision torch Linear math; difference is only the
    # bf16 input quantization, so a loose sanity bound suffices.
    ref_fp = edge_attr @ weight.T + bias
    assert jnp.allclose(out, ref_fp, atol=1e-1, rtol=0.0), "mismatch vs f32 reference"

    print("KERNEL_OK")
</pallas_src>

<mosaic_0001>
module attributes {stable_mosaic.version = 11 : i64} {
  func.func @_linear_kernel(%arg0: i32, %arg1: memref<200x68xbf16, #tpu.memory_space<vmem>>, %arg2: memref<68x32xbf16, #tpu.memory_space<vmem>>, %arg3: memref<1x32xf32, #tpu.memory_space<vmem>>, %arg4: memref<200x32xf32, #tpu.memory_space<vmem>>) attributes {dimension_semantics = [#tpu.dimension_semantics<parallel>], iteration_bounds = array<i64: 1>, scalar_prefetch = 0 : i64, scratch_operands = 0 : i64, tpu.core_type = #tpu.core_type<tc>, window_params = [{transform_indices = @transform_0, window_bounds = array<i64: 200, 68>}, {pipeline_mode = #tpu.pipeline_mode<synchronous>, transform_indices = @transform_1, window_bounds = array<i64: 68, 32>}, {pipeline_mode = #tpu.pipeline_mode<synchronous>, transform_indices = @transform_2, window_bounds = array<i64: 1, 32>}, {transform_indices = @transform_3, window_bounds = array<i64: 200, 32>}]} {
    %c0 = arith.constant 0 : index
    %c0_0 = arith.constant 0 : index
    %0 = vector.load %arg1[%c0, %c0_0] : memref<200x68xbf16, #tpu.memory_space<vmem>>, vector<200x68xbf16>
    %c0_1 = arith.constant 0 : index
    %c0_2 = arith.constant 0 : index
    %1 = vector.load %arg2[%c0_1, %c0_2] : memref<68x32xbf16, #tpu.memory_space<vmem>>, vector<68x32xbf16>
    %cst = arith.constant dense<0.000000e+00> : vector<200x32xf32>
    %2 = tpu.matmul %0, %1, %cst {dimension_numbers = #tpu.dot_dimension_numbers<[1], [0], [0], [1], [0, 0, 1, 1], [], []>} : vector<200x68xbf16>, vector<68x32xbf16>, vector<200x32xf32> -> vector<200x32xf32>
    %c0_3 = arith.constant 0 : index
    %c0_4 = arith.constant 0 : index
    %3 = vector.load %arg3[%c0_3, %c0_4] : memref<1x32xf32, #tpu.memory_space<vmem>>, vector<1x32xf32>
    %4 = vector.broadcast %3 : vector<1x32xf32> to vector<200x32xf32>
    %5 = arith.addf %2, %4 : vector<200x32xf32>
    %c0_5 = arith.constant 0 : index
    %c0_6 = arith.constant 0 : index
    %6 = vector.load %arg4[%c0_5, %c0_6] : memref<200x32xf32, #tpu.memory_space<vmem>>, vector<200x32xf32>
    tpu.vector_store %arg4[%c0_5, %c0_6], %5 {strides = array<i32>} : memref<200x32xf32, #tpu.memory_space<vmem>>, vector<200x32xf32>,
    return
  }
  func.func @transform_0(%arg0: i32) -> (i32, i32) {
    %c0_i32 = arith.constant 0 : i32
    %c0_i32_0 = arith.constant 0 : i32
    return %arg0, %c0_i32 : i32, i32
  }
  func.func @transform_1(%arg0: i32) -> (i32, i32) {
    %c0_i32 = arith.constant 0 : i32
    %c0_i32_0 = arith.constant 0 : i32
    %c0_i32_1 = arith.constant 0 : i32
    return %c0_i32, %c0_i32_0 : i32, i32
  }
  func.func @transform_2(%arg0: i32) -> (i32, i32) {
    %c0_i32 = arith.constant 0 : i32
    %c0_i32_0 = arith.constant 0 : i32
    %c0_i32_1 = arith.constant 0 : i32
    return %c0_i32, %c0_i32_0 : i32, i32
  }
  func.func @transform_3(%arg0: i32) -> (i32, i32) {
    %c0_i32 = arith.constant 0 : i32
    %c0_i32_0 = arith.constant 0 : i32
    return %arg0, %c0_i32 : i32, i32
  }
}

</mosaic_0001>

<bundles_post_ra>
// kernel: linear_edge_encoder.1
= control target key start
LH: loop header
LB: loop body
LE: loop exit
PB: predicated region body
PF: predicated region fallthrough
CT: control target
= control target key end

     0   :  { %vm186_vm0 = vcmask 1041408   ;;  %v498_v0 = vmov 0.0   ;;  %vm499_vm1 = vmmov 0   ;;  %vm146_vm2 = vcmask 556032   ;;  %s753_s1 = inlined_call_operand.vmem [shape: bf16[68,32], index: 1, kind: input, shape index: {}]   ;;  %s754_s0 = inlined_call_operand.vmem [shape: bf16[200,68], index: 0, kind: input, shape index: {}]   ;;  %s755_s2 = inlined_call_operand.vmem [shape: f32[1,32], index: 2, kind: input, shape index: {}]   ;;  %s756_s3 = inlined_call_operand.vmem [shape: f32[200,32], index: 3, kind: output, shape index: {}]  }
   0x1   :  { %406 = vmatprep.subr.bf16.mxu0 %v498_v0  ;;  %v480_v1 = vld [vmem:[%s753_s1 + $0x20] ss:$0 sps:$4 sm:$0x33]   ;;  %468 = vmatprep.subr.bf16.mxu1 %v498_v0  ;;  %v481_v3 = vld [vmem:[%s753_s1 + $0x18] sm:$0xff]   ;;  %v482_v4 = vld [vmem:[%s753_s1 + $0x10] sm:$0xff]   ;;  %vm326_vm3 = vcmask 261120  }
   0x2   :  { %416 = vmatprep.mubr.msk.bf16.mxu0 %vm499_vm1, %v498_v0  ;;  %444 = vmatprep.mubr.msk.bf16.mxu1 %vm499_vm1, %v498_v0  ;;  %v188_v2 = vsel %vm186_vm0, %v480_v1, 0  ;;  %v483_v5 = vld [vmem:[%s753_s1 + $0x8] sm:$0xff]   ;;  %v484_v6 = vld [vmem:[%s753_s1] sm:$0xff]   ;;  %v486_v8 = vld [vmem:[%s754_s0 + $0x38] sm:$0xff]  }
   0x3   :  { %407 = vmatpush3.bf16.msra.mxu0 %v188_v2  ;;  %473 = vmatpush3.bf16.msra.mxu1 %v188_v2  ;;  %v485_v7 = vld [vmem:[%s754_s0] sm:$0xff]   ;;  %v487_v9 = vld [vmem:[%s754_s0 + $0x8] sm:$0xff]   ;;  %v489_v11 = vld [vmem:[%s754_s0 + $0x10] sm:$0xff]  }
   0x4   :  { %408 = vmatprep.subr.bf16.mxu0 %v498_v0  ;;  %469 = vmatprep.subr.bf16.mxu1 %v498_v0  ;;  %v488_v10 = vld [vmem:[%s754_s0 + $0x40] sm:$0xff]   ;;  %v490_v12 = vld [vmem:[%s754_s0 + $0x48] sm:$0xff]   ;;  %v491_v13 = vld [vmem:[%s754_s0 + $0x18] sm:$0xff]  }
   0x5   :  { %v492_v14 = vld [vmem:[%s754_s0 + $0x50] sm:$0xff]   ;;  %v493_v15 = vld [vmem:[%s754_s0 + $0x20] sm:$0xff]   ;;  %v494_v16 = vld [vmem:[%s754_s0 + $0x58] sm:$0xff]  }
   0x6   :  { %v495_v17 = vld [vmem:[%s754_s0 + $0x28] sm:$0xff]   ;;  %v496_v18 = vld [vmem:[%s754_s0 + $0x60] ss:$0 sps:$4 sm:$0xff]   ;;  %v497_v19 = vld [vmem:[%s754_s0 + $0x30] sm:$0xff]  }
   0x7   :  { %409 = vmatpush3.bf16.msra.mxu0 %v481_v3  ;;  %474 = vmatpush3.bf16.msra.mxu1 %v481_v3  ;;  %v626_v20 = vld [vmem:[%s755_s2] ss:$0 sm:$0xff] }
   0x8   :  { %410 = vmatprep.subr.bf16.mxu0 %v498_v0  ;;  %470 = vmatprep.subr.bf16.mxu1 %v498_v0 }
   0xb   :  { %411 = vmatpush3.bf16.msra.mxu0 %v482_v4  ;;  %475 = vmatpush3.bf16.msra.mxu1 %v482_v4 }
   0xc   :  { %412 = vmatprep.subr.bf16.mxu0 %v498_v0  ;;  %471 = vmatprep.subr.bf16.mxu1 %v498_v0 }
   0xf   :  { %413 = vmatpush3.bf16.msra.mxu0 %v483_v5  ;;  %476 = vmatpush3.bf16.msra.mxu1 %v483_v5 }
  0x10   :  { %414 = vmatprep.subr.bf16.mxu0 %v498_v0  ;;  %472 = vmatprep.subr.bf16.mxu1 %v498_v0 }
  0x13   :  { %415 = vmatpush3.bf16.msra.mxu0 %v484_v6  ;;  %477 = vmatpush3.bf16.msra.mxu1 %v484_v6 }
  0x16   :  { %417 = vmatmul.mubr.msk.bf16.vlgmr.msra.gmra.mxu0 %vm146_vm2, %v485_v7  ;;  %445 = vmatmul.mubr.msk.bf16.vlgmr.msra.gmra.mxu1 %vm146_vm2, %v486_v8 }
  0x17   :  { %420 = vmatprep.mubr.msk.bf16.mxu0 %vm499_vm1, %v498_v0  ;;  %448 = vmatprep.mubr.msk.bf16.mxu1 %vm499_vm1, %v498_v0 }
  0x1e   :  { %421 = vmatmul.mubr.msk.bf16.gmra.mxu0 %vm146_vm2, %v487_v9  ;;  %449 = vmatmul.mubr.msk.bf16.gmra.mxu1 %vm146_vm2, %v488_v10 }
  0x1f   :  { %424 = vmatprep.mubr.msk.bf16.mxu0 %vm499_vm1, %v498_v0  ;;  %452 = vmatprep.mubr.msk.bf16.mxu1 %vm499_vm1, %v498_v0 }
  0x26   :  { %425 = vmatmul.mubr.msk.bf16.gmra.mxu0 %vm146_vm2, %v489_v11  ;;  %453 = vmatmul.mubr.msk.bf16.gmra.mxu1 %vm146_vm2, %v490_v12 }
  0x27   :  { %428 = vmatprep.mubr.msk.bf16.mxu0 %vm499_vm1, %v498_v0  ;;  %456 = vmatprep.mubr.msk.bf16.mxu1 %vm499_vm1, %v498_v0 }
  0x2e   :  { %429 = vmatmul.mubr.msk.bf16.gmra.mxu0 %vm146_vm2, %v491_v13  ;;  %457 = vmatmul.mubr.msk.bf16.gmra.mxu1 %vm146_vm2, %v492_v14 }
  0x2f   :  { %432 = vmatprep.mubr.msk.bf16.mxu0 %vm499_vm1, %v498_v0  ;;  %460 = vmatprep.mubr.msk.bf16.mxu1 %vm499_vm1, %v498_v0 }
  0x36   :  { %433 = vmatmul.mubr.msk.bf16.gmra.mxu0 %vm146_vm2, %v493_v15  ;;  %461 = vmatmul.mubr.msk.bf16.gmra.mxu1 %vm146_vm2, %v494_v16 }
  0x37   :  { %436 = vmatprep.mubr.msk.bf16.mxu0 %vm499_vm1, %v498_v0  ;;  %464 = vmatprep.mubr.msk.bf16.mxu1 %vm499_vm1, %v498_v0 }
  0x3e   :  { %437 = vmatmul.mubr.msk.bf16.gmra.mxu0 %vm146_vm2, %v495_v17  ;;  %465 = vmatmul.mubr.msk.bf16.gmra.mxu1 %vm146_vm2, %v496_v18 }
  0x3f   :  { %440 = vmatprep.mubr.msk.bf16.mxu0 %vm499_vm1, %v498_v0 }
  0x46   :  { %441 = vmatmul.mubr.msk.bf16.gmra.mxu0 %vm146_vm2, %v497_v19 }
  0xd6   :  { %v224_v21 = vpop.f32.mrf.mxu0  ;;  %v280_v22 = vpop.f32.mrf.mxu1 }
  0xd7   :  { %v225_v23 = vadd.f32 %v626_v20, %v224_v21  ;;  %v281_v24 = vadd.f32 %v626_v20, %v280_v22 }
  0xd8   :  { %v418_v25 = vpop.f32.mrf.mxu0  ;;  %v446_v26 = vpop.f32.mrf.mxu1 }
  0xd9   :  { %327 = vst.msk [vmem:[%s756_s3] sm:$0xff] %vm326_vm3, %v225_v23  ;;  %341 = vst.msk [vmem:[%s756_s3 + $0x70] sm:$0xff] %vm326_vm3, %v281_v24 }
  0xda   :  { %v227_v27 = vpop.f32.mrf.mxu0  ;;  %v283_v28 = vpop.f32.mrf.mxu1 }
  0xdb   :  { %v228_v29 = vadd.f32 %v626_v20, %v227_v27  ;;  %v284_v30 = vadd.f32 %v626_v20, %v283_v28 }
  0xdc   :  { %v419_v31 = vpop.f32.mrf.mxu0  ;;  %v447_v32 = vpop.f32.mrf.mxu1 }
  0xdd   :  { %328 = vst.msk [vmem:[%s756_s3 + $0x8] sm:$0xff] %vm326_vm3, %v228_v29  ;;  %342 = vst.msk [vmem:[%s756_s3 + $0x78] sm:$0xff] %vm326_vm3, %v284_v30 }
  0xde   :  { %v232_v33 = vpop.f32.mrf.mxu0  ;;  %v288_v34 = vpop.f32.mrf.mxu1 }
  0xdf   :  { %v233_v35 = vadd.f32 %v626_v20, %v232_v33  ;;  %v289_v36 = vadd.f32 %v626_v20, %v288_v34 }
  0xe0   :  { %v422_v37 = vpop.f32.mrf.mxu0  ;;  %v450_v38 = vpop.f32.mrf.mxu1 }
  0xe1   :  { %329 = vst.msk [vmem:[%s756_s3 + $0x10] sm:$0xff] %vm326_vm3, %v233_v35  ;;  %343 = vst.msk [vmem:[%s756_s3 + $0x80] sm:$0xff] %vm326_vm3, %v289_v36 }
  0xe2   :  { %v235_v39 = vpop.f32.mrf.mxu0  ;;  %v291_v40 = vpop.f32.mrf.mxu1 }
  0xe3   :  { %v236_v41 = vadd.f32 %v626_v20, %v235_v39  ;;  %v292_v42 = vadd.f32 %v626_v20, %v291_v40 }
  0xe4   :  { %v423_v43 = vpop.f32.mrf.mxu0  ;;  %v451_v44 = vpop.f32.mrf.mxu1 }
  0xe5   :  { %330 = vst.msk [vmem:[%s756_s3 + $0x18] sm:$0xff] %vm326_vm3, %v236_v41  ;;  %344 = vst.msk [vmem:[%s756_s3 + $0x88] sm:$0xff] %vm326_vm3, %v292_v42 }
  0xe6   :  { %v240_v45 = vpop.f32.mrf.mxu0  ;;  %v296_v46 = vpop.f32.mrf.mxu1 }
  0xe7   :  { %v241_v47 = vadd.f32 %v626_v20, %v240_v45  ;;  %v297_v48 = vadd.f32 %v626_v20, %v296_v46 }
  0xe8   :  { %v426_v49 = vpop.f32.mrf.mxu0  ;;  %v454_v50 = vpop.f32.mrf.mxu1 }
  0xe9   :  { %331 = vst.msk [vmem:[%s756_s3 + $0x20] sm:$0xff] %vm326_vm3, %v241_v47  ;;  %345 = vst.msk [vmem:[%s756_s3 + $0x90] sm:$0xff] %vm326_vm3, %v297_v48 }
  0xea   :  { %v243_v51 = vpop.f32.mrf.mxu0  ;;  %v299_v52 = vpop.f32.mrf.mxu1 }
  0xeb   :  { %v244_v53 = vadd.f32 %v626_v20, %v243_v51  ;;  %v300_v54 = vadd.f32 %v626_v20, %v299_v52 }
  0xec   :  { %v427_v55 = vpop.f32.mrf.mxu0  ;;  %v455_v56 = vpop.f32.mrf.mxu1 }
  0xed   :  { %332 = vst.msk [vmem:[%s756_s3 + $0x28] sm:$0xff] %vm326_vm3, %v244_v53  ;;  %346 = vst.msk [vmem:[%s756_s3 + $0x98] sm:$0xff] %vm326_vm3, %v300_v54 }
  0xee   :  { %v248_v57 = vpop.f32.mrf.mxu0  ;;  %v304_v58 = vpop.f32.mrf.mxu1 }
  0xef   :  { %v249_v59 = vadd.f32 %v626_v20, %v248_v57  ;;  %v305_v60 = vadd.f32 %v626_v20, %v304_v58 }
  0xf0   :  { %v430_v61 = vpop.f32.mrf.mxu0  ;;  %v458_v62 = vpop.f32.mrf.mxu1 }
  0xf1   :  { %333 = vst.msk [vmem:[%s756_s3 + $0x30] sm:$0xff] %vm326_vm3, %v249_v59  ;;  %347 = vst.msk [vmem:[%s756_s3 + $0xa0] sm:$0xff] %vm326_vm3, %v305_v60 }
  0xf2   :  { %v251_v63 = vpop.f32.mrf.mxu0  ;;  %v307_v0 = vpop.f32.mrf.mxu1 }
  0xf3   :  { %v252_v1 = vadd.f32 %v626_v20, %v251_v63  ;;  %v308_v2 = vadd.f32 %v626_v20, %v307_v0 }
  0xf4   :  { %v431_v3 = vpop.f32.mrf.mxu0  ;;  %v459_v4 = vpop.f32.mrf.mxu1 }
  0xf5   :  { %334 = vst.msk [vmem:[%s756_s3 + $0x38] sm:$0xff] %vm326_vm3, %v252_v1  ;;  %348 = vst.msk [vmem:[%s756_s3 + $0xa8] sm:$0xff] %vm326_vm3, %v308_v2 }
  0xf6   :  { %v256_v5 = vpop.f32.mrf.mxu0  ;;  %v312_v6 = vpop.f32.mrf.mxu1 }
  0xf7   :  { %v257_v7 = vadd.f32 %v626_v20, %v256_v5  ;;  %v313_v8 = vadd.f32 %v626_v20, %v312_v6 }
  0xf8   :  { %v434_v9 = vpop.f32.mrf.mxu0  ;;  %v462_v10 = vpop.f32.mrf.mxu1 }
  0xf9   :  { %335 = vst.msk [vmem:[%s756_s3 + $0x40] sm:$0xff] %vm326_vm3, %v257_v7  ;;  %349 = vst.msk [vmem:[%s756_s3 + $0xb0] sm:$0xff] %vm326_vm3, %v313_v8 }
  0xfa   :  { %v259_v11 = vpop.f32.mrf.mxu0  ;;  %v315_v12 = vpop.f32.mrf.mxu1 }
  0xfb   :  { %v260_v13 = vadd.f32 %v626_v20, %v259_v11  ;;  %v316_v14 = vadd.f32 %v626_v20, %v315_v12 }
  0xfc   :  { %v435_v15 = vpop.f32.mrf.mxu0  ;;  %v463_v16 = vpop.f32.mrf.mxu1 }
  0xfd   :  { %336 = vst.msk [vmem:[%s756_s3 + $0x48] sm:$0xff] %vm326_vm3, %v260_v13  ;;  %350 = vst.msk [vmem:[%s756_s3 + $0xb8] sm:$0xff] %vm326_vm3, %v316_v14 }
  0xfe   :  { %v264_v17 = vpop.f32.mrf.mxu0  ;;  %v320_v18 = vpop.f32.mrf.mxu1 }
  0xff   :  { %v265_v19 = vadd.f32 %v626_v20, %v264_v17  ;;  %v321_v21 = vadd.f32 %v626_v20, %v320_v18 }
 0x100   :  { %v438_v22 = vpop.f32.mrf.mxu0  ;;  %v466_v23 = vpop.f32.mrf.mxu1 }
 0x101   :  { %337 = vst.msk [vmem:[%s756_s3 + $0x50] sm:$0xff] %vm326_vm3, %v265_v19  ;;  %351 = vst.msk [vmem:[%s756_s3 + $0xc0] sm:$0xff] %vm326_vm3, %v321_v21 }
 0x102   :  { %v267_v24 = vpop.f32.mrf.mxu0  ;;  %v323_v25 = vpop.f32.mrf.mxu1 }
 0x103   :  { %v268_v26 = vadd.f32 %v626_v20, %v267_v24 }
 0x104   :  { %v439_v27 = vpop.f32.mrf.mxu0  ;;  %v467_v28 = vpop.f32.mrf.mxu1 }
 0x105   :  { %338 = vst.msk [vmem:[%s756_s3 + $0x58] sm:$0xff] %vm326_vm3, %v268_v26 }
 0x106   :  { %v272_v29 = vpop.f32.mrf.mxu0 }
 0x107   :  { %v273_v30 = vadd.f32 %v626_v20, %v272_v29 }
 0x108   :  { %v442_v31 = vpop.f32.mrf.mxu0 }
 0x109   :  { %339 = vst.msk [vmem:[%s756_s3 + $0x60] sm:$0xff] %vm326_vm3, %v273_v30 }
 0x10a   :  { %v275_v32 = vpop.f32.mrf.mxu0 }
 0x10b   :  { %v276_v33 = vadd.f32 %v626_v20, %v275_v32 }
 0x10c   :  { %v443_v34 = vpop.f32.mrf.mxu0 }
 0x10d   :  { %340 = vst.msk [vmem:[%s756_s3 + $0x68] sm:$0xff] %vm326_vm3, %v276_v33 }

</bundles_post_ra>
